<compile_context>
chip_gen: v6e
topology: v6e:2x2x1
jax: 0.10.0
libtpu: 0.0.40
codegen_flags: <defaults>
</compile_context>

<pallas_src>
import functools

import jax
import jax.numpy as jnp
from jax.experimental import pallas as pl
from jax.experimental.pallas import tpu as pltpu

NUM_TASKS = 3          # stand-in for pargs.num_tasks
EPS = 1e-5             # nn.BatchNorm2d default eps
MOMENTUM = 0.1         # nn.BatchNorm2d default momentum


# ----------------------------------------------------------------- tile picking

def _pick_tile(dim, align, max_tile):
    """Largest multiple of `align` that evenly divides `dim` and is <= max_tile.
    Falls back to the full dim (always a legal TPU block size)."""
    if dim % align != 0:
        return dim
    best = align
    t = align
    limit = min(dim, max(align, max_tile))
    while t <= limit:
        if dim % t == 0:
            best = t
        t += align
    return best


def _pick_c_tile(c, lt, bytes_per_elem=4, per_buffer_budget=1 << 20):
    """Channel tile: multiple of 8 dividing C, sized so one (Ct, Lt) f32 buffer stays
    within ~1 MiB (=> ~4 MiB with double-buffered in+out blocks; safe on v5e/v6e/v7x)."""
    if c % 8 != 0:
        return c
    max_ct = max(8, (per_buffer_budget // max(1, lt * bytes_per_elem)) // 8 * 8)
    return _pick_tile(c, 8, max_ct)


# ----------------------------------------------------------------- kernels

def _fused_bn_kernel(x_ref, y_ref, mean_ref, var_ref, *, eps, inv_count):
    """Small-input fast path: whole (N, C, L) tensor in one block, centered variance."""
    x = x_ref[...].astype(jnp.float32)                                    # (N, C, L)
    mean = jnp.sum(jnp.sum(x, axis=2, keepdims=True),
                   axis=0, keepdims=True) * inv_count                     # (1, C, 1)
    centered = x - mean
    var = jnp.sum(jnp.sum(centered * centered, axis=2, keepdims=True),
                  axis=0, keepdims=True) * inv_count                      # (1, C, 1)
    rstd = jax.lax.rsqrt(var + eps)
    y_ref[...] = (centered * rstd).astype(y_ref.dtype)
    mean_ref[...] = mean[0]                                               # (C, 1)
    var_ref[...] = var[0]


def _stats_kernel(x_ref, mean_ref, var_ref, sum_ref, sumsq_ref, *, inv_count):
    """Pass 1: accumulate per-channel sum / sum(x^2) across the N and HW grid axes."""
    n, li = pl.program_id(1), pl.program_id(2)

    @pl.when((n == 0) & (li == 0))
    def _():
        sum_ref[...] = jnp.zeros_like(sum_ref)
        sumsq_ref[...] = jnp.zeros_like(sumsq_ref)

    x = x_ref[...].astype(jnp.float32)[0]                                 # (Ct, Lt)
    sum_ref[...] += jnp.sum(x, axis=1, keepdims=True)
    sumsq_ref[...] += jnp.sum(x * x, axis=1, keepdims=True)

    @pl.when((n == pl.num_programs(1) - 1) & (li == pl.num_programs(2) - 1))
    def _():
        mean = sum_ref[...] * inv_count
        # E[x^2] - mean^2 with f32 accumulators; clamp guards tiny negative drift.
        var = jnp.maximum(sumsq_ref[...] * inv_count - mean * mean, 0.0)
        mean_ref[...] = mean
        var_ref[...] = var


def _normalize_kernel(x_ref, mean_ref, var_ref, o_ref, *, eps):
    """Pass 2: lane-dense elementwise normalize."""
    x = x_ref[...].astype(jnp.float32)                                    # (1, Ct, Lt)
    mean = mean_ref[...][None, :, :]                                      # (1, Ct, 1)
    rstd = jax.lax.rsqrt(var_ref[...][None, :, :] + eps)
    o_ref[...] = ((x - mean) * rstd).astype(o_ref.dtype)


# ----------------------------------------------------------------- pallas wrappers

def _fused_bn(x3, eps):
    N, C, L = x3.shape
    kernel = functools.partial(_fused_bn_kernel, eps=eps, inv_count=1.0 / (N * L))
    return pl.pallas_call(
        kernel,
        out_shape=(jax.ShapeDtypeStruct((N, C, L), x3.dtype),
                   jax.ShapeDtypeStruct((C, 1), jnp.float32),
                   jax.ShapeDtypeStruct((C, 1), jnp.float32)),
        grid=(1,),
        in_specs=[pl.BlockSpec((N, C, L), lambda i: (0, 0, 0))],
        out_specs=(pl.BlockSpec((N, C, L), lambda i: (0, 0, 0)),
                   pl.BlockSpec((C, 1), lambda i: (0, 0)),
                   pl.BlockSpec((C, 1), lambda i: (0, 0))),
    )(x3)


def _batch_stats(x3):
    N, C, L = x3.shape
    lt = _pick_tile(L, 128, 2048)
    ct = _pick_c_tile(C, lt)
    kernel = functools.partial(_stats_kernel, inv_count=1.0 / (N * L))
    return pl.pallas_call(
        kernel,
        out_shape=(jax.ShapeDtypeStruct((C, 1), jnp.float32),
                   jax.ShapeDtypeStruct((C, 1), jnp.float32)),
        grid=(C // ct, N, L // lt),
        in_specs=[pl.BlockSpec((1, ct, lt), lambda ci, n, li: (n, ci, li))],
        out_specs=(pl.BlockSpec((ct, 1), lambda ci, n, li: (ci, 0)),
                   pl.BlockSpec((ct, 1), lambda ci, n, li: (ci, 0))),
        scratch_shapes=[pltpu.VMEM((ct, 1), jnp.float32),
                        pltpu.VMEM((ct, 1), jnp.float32)],
        compiler_params=pltpu.CompilerParams(
            dimension_semantics=("parallel", "arbitrary", "arbitrary")),
    )(x3)


def _normalize(x3, mean, var, eps):
    N, C, L = x3.shape
    lt = _pick_tile(L, 128, 2048)
    ct = _pick_c_tile(C, lt)
    kernel = functools.partial(_normalize_kernel, eps=eps)
    # TODO(synk): add input_output_aliases={0: 0} when x is known dead after this call.
    return pl.pallas_call(
        kernel,
        out_shape=jax.ShapeDtypeStruct((N, C, L), x3.dtype),
        grid=(C // ct, N, L // lt),
        in_specs=[pl.BlockSpec((1, ct, lt), lambda ci, n, li: (n, ci, li)),
                  pl.BlockSpec((ct, 1), lambda ci, n, li: (ci, 0)),
                  pl.BlockSpec((ct, 1), lambda ci, n, li: (ci, 0))],
        out_specs=pl.BlockSpec((1, ct, lt), lambda ci, n, li: (n, ci, li)),
        compiler_params=pltpu.CompilerParams(
            dimension_semantics=("parallel", "parallel", "parallel")),
    )(x3, mean, var)


# ----------------------------------------------------------------- module

class MultitaskNonAffineBN:
    """JAX/Pallas port of the PyTorch module (training + eval forward)."""

    def __init__(self, dim, num_tasks=NUM_TASKS, eps=EPS, momentum=MOMENTUM):
        self.dim = dim
        self.num_tasks = num_tasks
        self.task = 0
        self.training = True
        self.eps = eps
        self.momentum = momentum
        self.use_fused_fast_path = True
        # affine=False -> no weight/bias; per-task running stats (eval mode uses them).
        self.running_mean = [jnp.zeros((dim,), jnp.float32) for _ in range(num_tasks)]
        self.running_var = [jnp.ones((dim,), jnp.float32) for _ in range(num_tasks)]

    def __call__(self, x):
        # x: (N, C, H, W) PyTorch NCHW layout.
        N, C, H, W = x.shape
        assert C == self.dim
        L = H * W
        x3 = x.reshape(N, C, L)       # free view: no transpose, no extra HBM traffic
        task = self.task

        if self.training:
            count = N * L
            # Fast path: whole tensor comfortably fits scoped VMEM on every generation.
            if self.use_fused_fast_path and (N * C * L * 4) <= (2 << 20):
                y3, mean, var = _fused_bn(x3, self.eps)
            else:
                mean, var = _batch_stats(x3)
                y3 = _normalize(x3, mean, var, self.eps)
            # PyTorch-style EMA of running stats (unbiased var), eager side effect.
            # TODO(synk): make this functional (return new state) if used under jit.
            bessel = count / max(count - 1, 1)
            m = self.momentum
            self.running_mean[task] = (
                (1.0 - m) * self.running_mean[task] + m * mean.reshape(-1))
            self.running_var[task] = (
                (1.0 - m) * self.running_var[task] + m * var.reshape(-1) * bessel)
        else:
            mean = self.running_mean[task].reshape(C, 1).astype(jnp.float32)
            var = self.running_var[task].reshape(C, 1).astype(jnp.float32)
            y3 = _normalize(x3, mean, var, self.eps)

        return y3.reshape(N, C, H, W)


# ----------------------------------------------------------------- tests

def _reference_train(x, eps=EPS):
    """Pure-JAX reference matching PyTorch BatchNorm2d(affine=False).train()."""
    mean = jnp.mean(x, axis=(0, 2, 3), keepdims=True)
    var = jnp.mean((x - mean) ** 2, axis=(0, 2, 3), keepdims=True)
    return (x - mean) / jnp.sqrt(var + eps)


if __name__ == "__main__":
    key = jax.random.PRNGKey(0)
    k1, k2 = jax.random.split(key)

    # --- small input: fused single-block fast path ---------------------------
    x_small = jax.random.normal(k1, (2, 4, 16, 16), dtype=jnp.float32)
    m_small = MultitaskNonAffineBN(dim=4)
    m_small.task = 0
    y_small = jax.block_until_ready(m_small(x_small))
    assert y_small.shape == x_small.shape and y_small.dtype == x_small.dtype
    assert jnp.max(jnp.abs(y_small - _reference_train(x_small))) < 1e-4

    # --- tiled two-pass path (forced, exercises stats + normalize pipeline) --
    x_big = jax.random.normal(k2, (2, 8, 16, 16), dtype=jnp.float32)
    m_big = MultitaskNonAffineBN(dim=8)
    m_big.task = 1
    m_big.use_fused_fast_path = False
    y_big = jax.block_until_ready(m_big(x_big))
    assert y_big.shape == x_big.shape and y_big.dtype == x_big.dtype
    assert jnp.max(jnp.abs(y_big - _reference_train(x_big))) < 1e-4

    # --- eval mode: normalize with the selected task's running stats ---------
    m_big.training = False
    y_eval = jax.block_until_ready(m_big(x_big))
    rm = m_big.running_mean[1][None, :, None, None]
    rv = m_big.running_var[1][None, :, None, None]
    y_eval_ref = (x_big - rm) / jnp.sqrt(rv + EPS)
    assert jnp.max(jnp.abs(y_eval - y_eval_ref)) < 1e-4

    print("KERNEL_OK")
</pallas_src>

<mosaic_0001>
module attributes {stable_mosaic.version = 11 : i64} {
  func.func @_fused_bn_kernel(%arg0: i32, %arg1: memref<2x4x256xf32, #tpu.memory_space<vmem>>, %arg2: memref<2x4x256xf32, #tpu.memory_space<vmem>>, %arg3: memref<4x1xf32, #tpu.memory_space<vmem>>, %arg4: memref<4x1xf32, #tpu.memory_space<vmem>>) attributes {dimension_semantics = [#tpu.dimension_semantics<arbitrary>], iteration_bounds = array<i64: 1>, scalar_prefetch = 0 : i64, scratch_operands = 0 : i64, tpu.core_type = #tpu.core_type<tc>, window_params = [{pipeline_mode = #tpu.pipeline_mode<synchronous>, transform_indices = @transform_0, window_bounds = array<i64: 2, 4, 256>}, {pipeline_mode = #tpu.pipeline_mode<synchronous>, transform_indices = @transform_1, window_bounds = array<i64: 2, 4, 256>}, {pipeline_mode = #tpu.pipeline_mode<synchronous>, transform_indices = @transform_2, window_bounds = array<i64: 4, 1>}, {pipeline_mode = #tpu.pipeline_mode<synchronous>, transform_indices = @transform_3, window_bounds = array<i64: 4, 1>}]} {
    %c0 = arith.constant 0 : index
    %c0_0 = arith.constant 0 : index
    %c0_1 = arith.constant 0 : index
    %0 = vector.load %arg1[%c0, %c0_0, %c0_1] : memref<2x4x256xf32, #tpu.memory_space<vmem>>, vector<2x4x256xf32>
    %cst = arith.constant dense<0.000000e+00> : vector<2x4xf32>
    %1 = vector.multi_reduction <add>, %0, %cst [2] : vector<2x4x256xf32> to vector<2x4xf32>
    %2 = vector.shape_cast %1 : vector<2x4xf32> to vector<2x4x1xf32>
    %cst_2 = arith.constant dense<0.000000e+00> : vector<4x1xf32>
    %3 = vector.multi_reduction <add>, %2, %cst_2 [0] : vector<2x4x1xf32> to vector<4x1xf32>
    %4 = vector.shape_cast %3 : vector<4x1xf32> to vector<1x4x1xf32>
    %cst_3 = arith.constant 0.001953125 : f32
    %5 = vector.broadcast %cst_3 : f32 to vector<1x4x1xf32>
    %6 = arith.mulf %4, %5 : vector<1x4x1xf32>
    %7 = vector.broadcast %6 : vector<1x4x1xf32> to vector<2x4x256xf32>
    %8 = arith.subf %0, %7 : vector<2x4x256xf32>
    %9 = arith.mulf %8, %8 : vector<2x4x256xf32>
    %cst_4 = arith.constant dense<0.000000e+00> : vector<2x4xf32>
    %10 = vector.multi_reduction <add>, %9, %cst_4 [2] : vector<2x4x256xf32> to vector<2x4xf32>
    %11 = vector.shape_cast %10 : vector<2x4xf32> to vector<2x4x1xf32>
    %cst_5 = arith.constant dense<0.000000e+00> : vector<4x1xf32>
    %12 = vector.multi_reduction <add>, %11, %cst_5 [0] : vector<2x4x1xf32> to vector<4x1xf32>
    %13 = vector.shape_cast %12 : vector<4x1xf32> to vector<1x4x1xf32>
    %cst_6 = arith.constant 0.001953125 : f32
    %14 = vector.broadcast %cst_6 : f32 to vector<1x4x1xf32>
    %15 = arith.mulf %13, %14 : vector<1x4x1xf32>
    %cst_7 = arith.constant 9.99999974E-6 : f32
    %16 = vector.broadcast %cst_7 : f32 to vector<1x4x1xf32>
    %17 = arith.addf %15, %16 : vector<1x4x1xf32>
    %18 = math.rsqrt %17 : vector<1x4x1xf32>
    %19 = vector.broadcast %18 : vector<1x4x1xf32> to vector<2x4x256xf32>
    %20 = arith.mulf %8, %19 : vector<2x4x256xf32>
    %c0_8 = arith.constant 0 : index
    %c0_9 = arith.constant 0 : index
    %c0_10 = arith.constant 0 : index
    %21 = vector.load %arg2[%c0_8, %c0_9, %c0_10] : memref<2x4x256xf32, #tpu.memory_space<vmem>>, vector<2x4x256xf32>
    tpu.vector_store %arg2[%c0_8, %c0_9, %c0_10], %20 {strides = array<i32>} : memref<2x4x256xf32, #tpu.memory_space<vmem>>, vector<2x4x256xf32>,
    %22 = vector.shape_cast %6 : vector<1x4x1xf32> to vector<4x1xf32>
    %c0_11 = arith.constant 0 : index
    %c0_12 = arith.constant 0 : index
    %23 = vector.load %arg3[%c0_11, %c0_12] : memref<4x1xf32, #tpu.memory_space<vmem>>, vector<4x1xf32>
    tpu.vector_store %arg3[%c0_11, %c0_12], %22 {strides = array<i32>} : memref<4x1xf32, #tpu.memory_space<vmem>>, vector<4x1xf32>,
    %24 = vector.shape_cast %15 : vector<1x4x1xf32> to vector<4x1xf32>
    %c0_13 = arith.constant 0 : index
    %c0_14 = arith.constant 0 : index
    %25 = vector.load %arg4[%c0_13, %c0_14] : memref<4x1xf32, #tpu.memory_space<vmem>>, vector<4x1xf32>
    tpu.vector_store %arg4[%c0_13, %c0_14], %24 {strides = array<i32>} : memref<4x1xf32, #tpu.memory_space<vmem>>, vector<4x1xf32>,
    return
  }
  func.func @transform_0(%arg0: i32) -> (i32, i32, i32) {
    %c0_i32 = arith.constant 0 : i32
    %c0_i32_0 = arith.constant 0 : i32
    %c0_i32_1 = arith.constant 0 : i32
    %c0_i32_2 = arith.constant 0 : i32
    return %c0_i32, %c0_i32_0, %c0_i32_1 : i32, i32, i32
  }
  func.func @transform_1(%arg0: i32) -> (i32, i32, i32) {
    %c0_i32 = arith.constant 0 : i32
    %c0_i32_0 = arith.constant 0 : i32
    %c0_i32_1 = arith.constant 0 : i32
    %c0_i32_2 = arith.constant 0 : i32
    return %c0_i32, %c0_i32_0, %c0_i32_1 : i32, i32, i32
  }
  func.func @transform_2(%arg0: i32) -> (i32, i32) {
    %c0_i32 = arith.constant 0 : i32
    %c0_i32_0 = arith.constant 0 : i32
    %c0_i32_1 = arith.constant 0 : i32
    return %c0_i32, %c0_i32_0 : i32, i32
  }
  func.func @transform_3(%arg0: i32) -> (i32, i32) {
    %c0_i32 = arith.constant 0 : i32
    %c0_i32_0 = arith.constant 0 : i32
    %c0_i32_1 = arith.constant 0 : i32
    return %c0_i32, %c0_i32_0 : i32, i32
  }
}

</mosaic_0001>

<bundles_post_ra>
// kernel: tpu_custom_call.1
= control target key start
LH: loop header
LB: loop body
LE: loop exit
PB: predicated region body
PF: predicated region fallthrough
CT: control target
= control target key end

     0   :  { %9 = vsyncpa [#allocation3], 0  ;;  %s235_s0 = inlined_call_operand.hbm [shape: f32[2,4,256], index: 0, kind: input, shape index: {}]   ;;  %s236_s1 = inlined_call_operand.hbm [shape: f32[2,4,256], index: 1, kind: output, shape index: {0}]   ;;  %s237_s2 = inlined_call_operand.vmem [shape: f32[4,1], index: 2, kind: output, shape index: {1}]   ;;  %s238_s3 = inlined_call_operand.vmem [shape: f32[4,1], index: 3, kind: output, shape index: {2}]  }
   0x1   :  { %10 = vsyncpa [#allocation4], 0  ;;  %s178_s12 = smov [#allocation2]  }
   0x2   :  { %s16_s13 = sshll.u32 %s178_s12, 4  ;;  %s17_s13 = int_to_ptr.vmem [resolvable:$true] %s16_s13 }
   0x3   :  { %s142_s14 = scalar_lea.vmem %s17_s13, 256  ;;  %p147_p1 = scmp.lt.s32.totalorder %s17_s13, %s17_s13 }
   0x4   :  { %p143_p0 = scmp.ne.s32.totalorder %s17_s13, %s142_s14  ;;  %p148_p2 = scmp.lt.s32.totalorder %s142_s14, %s142_s14 }
   0x6   :  { %p149_p3 = por %p148_p2, %p147_p1 }
   0x8   :  { %p150_p4 = pnand %p149_p3, %p143_p0 }
   0xa   :  { %153 = shalt.err (!%p150_p4)
}
   0xb   :  { %s179_s15 = smov 128   ;;  %s180_s16 = smov 8  }
   0xc   :  { %22 = dma.hbm_to_vmem [thread:$0]  %s235_s0, 256, %s17_s13, [#allocation3], %s179_s15, %s179_s15, %s180_s16  }
   0xd   :  { %174 = dma.done.wait [#allocation3], 256  }
   0xe   :  { %175 = vsyncadd [#allocation3], 4294967040  ;;  %vm34_vm0 = vcmask 1043456   ;;  %v26_v0 = vld [vmem:[#allocation2] sm:$0xff]  ;;  %v27_v1 = vld [vmem:[#allocation2 + $0x8] sm:$0xff]  ;;  %v53_v12 = vlaneseq  ;;  %vm97_vm1 = vcmask 3072  }
   0xf   :  { %v30_v2 = vcombine.high %v26_v0, %v26_v0  ;;  %v35_v3 = vsel %vm34_vm0, %v26_v0, 0.0  ;;  %v31_v4 = vcombine.high %v27_v1, %v27_v1  ;;  %v40_v6 = vsel %vm34_vm0, %v27_v1, 0.0  ;;  %s182_s21 = smov [#allocation5]  }
  0x10   :  { %v181_v10 = vmov 839922192   ;;  %v54_v15 = vshrl.u32 %v53_v12, 7  ;;  %s105_s22 = sshll.u32 %s182_s21, 4  ;;  %s106_s22 = int_to_ptr.vmem [resolvable:$true] %s105_s22 }
  0x11   :  { %v36_v5 = vsel %vm34_vm0, %v30_v2, 0.0  ;;  %v41_v7 = vsel %vm34_vm0, %v31_v4, 0.0  ;;  %v51_v11 = vunpack.c.l.s4 %v181_v10  ;;  %s154_s23 = scalar_lea.vmem %s106_s22, 256  ;;  %p159_p6 = scmp.lt.s32.totalorder %s106_s22, %s106_s22 }
  0x12   :  { %v37_v8 = vadd.f32 %v36_v5, %v35_v3  ;;  %v42_v9 = vadd.f32 %v41_v7, %v40_v6  ;;  %p155_p5 = scmp.ne.s32.totalorder %s106_s22, %s154_s23  ;;  %p160_p7 = scmp.lt.s32.totalorder %s154_s23, %s154_s23 }
  0x13   :  { %v52_v14 = vunpack.c.0.s8 %v51_v11 }
  0x14   :  { %38 = vadd.xlane.f32.xlu0 %v37_v8  ;;  %p161_p8 = por %p160_p7, %p159_p6 }
  0x15   :  { %v55_v19 = vsub.s32 %v52_v14, %v54_v15 }
  0x16   :  { %p162_p9 = pnand %p161_p8, %p155_p5 }
  0x18   :  { %43 = vadd.xlane.f32.xlu0 %v42_v9 }
  0x9d   :  { %v39_v13 = vpop.xlane.xlu0 %38 }
  0x9e   :  { %v45_v17 = vsel %vm34_vm0, %v39_v13, 0.0 }
  0xa1   :  { %v44_v16 = vpop.xlane.xlu0 %43 }
  0xa2   :  { %v46_v18 = vsel %vm34_vm0, %v44_v16, 0.0 }
  0xa3   :  { %v47_v20 = vadd.f32 %v46_v18, %v45_v17 }
  0xa5   :  { %v48_v21 = vmul.f32 0.001953125, %v47_v20 }
  0xa7   :  { %v56_v22 = vrot.slane %v48_v21, %v55_v19  ;;  %98 = vst.msk [vmem:[%s237_s2] sm:$0xf] %vm97_vm1, %v48_v21 }
  0xa9   :  { %v59_v23 = vsub.f32 %v27_v1, %v56_v22  ;;  %v58_v24 = vsub.f32 %v26_v0, %v56_v22 }
  0xab   :  { %v60_v25 = vmul.f32 %v58_v24, %v58_v24  ;;  %v61_v26 = vmul.f32 %v59_v23, %v59_v23 }
  0xad   :  { %v64_v27 = vcombine.high %v60_v25, %v60_v25  ;;  %v65_v28 = vcombine.high %v61_v26, %v61_v26  ;;  %v68_v29 = vsel %vm34_vm0, %v60_v25, 0.0  ;;  %v73_v33 = vsel %vm34_vm0, %v61_v26, 0.0 }
  0xaf   :  { %v69_v30 = vsel %vm34_vm0, %v64_v27, 0.0  ;;  %v74_v32 = vsel %vm34_vm0, %v65_v28, 0.0 }
  0xb0   :  { %v70_v31 = vadd.f32 %v69_v30, %v68_v29  ;;  %v75_v34 = vadd.f32 %v74_v32, %v73_v33 }
  0xb2   :  { %71 = vadd.xlane.f32.xlu1 %v70_v31 }
  0xb6   :  { %76 = vadd.xlane.f32.xlu1 %v75_v34 }
 0x13b   :  { %v72_v35 = vpop.xlane.xlu1 %71 }
 0x13c   :  { %v78_v37 = vsel %vm34_vm0, %v72_v35, 0.0 }
 0x13f   :  { %v77_v36 = vpop.xlane.xlu1 %76 }
 0x140   :  { %v79_v38 = vsel %vm34_vm0, %v77_v36, 0.0 }
 0x141   :  { %v80_v39 = vadd.f32 %v79_v38, %v78_v37 }
 0x143   :  { %v81_v40 = vmul.f32 0.001953125, %v80_v39 }
 0x145   :  { %v82_v41 = vadd.f32 1e-05, %v81_v40  ;;  %99 = vst.msk [vmem:[%s238_s3] sm:$0xf] %vm97_vm1, %v81_v40 }
 0x147   :  { %132 = vrsqrt.f32 %v82_v41 }
 0x154   :  { %v133_v42 = vpop.eup %132 }
 0x155   :  { %v91_v43 = vrot.slane %v133_v42, %v55_v19 }
 0x157   :  { %v93_v44 = vmul.f32 %v91_v43, %v58_v24  ;;  %v94_v45 = vmul.f32 %v91_v43, %v59_v23 }
 0x159   :  { %95 = vst [vmem:[#allocation5] sm:$0xff] %v93_v44  ;;  %96 = vst [vmem:[#allocation5 + $0x8] sm:$0xff] %v94_v45 }
 0x15a   :  { %165 = shalt.err (!%p162_p9)
}
 0x15b   :  { %111 = dma.vmem_to_hbm [thread:$0]  %s106_s22, 256, %s236_s1, [#allocation4], %s179_s15, %s179_s15, %s180_s16  }
 0x15c   :  { %176 = dma.done.wait [#allocation4], 256  }
 0x15d   :  { %177 = vsyncadd [#allocation4], 4294967040 }
 0x15e   :  { %123 = vsyncpa [#allocation3], 1 }
 0x15f   :  { %124 = vsyncpa [#allocation4], 1 }

</bundles_post_ra>
